<compile_context>
chip_gen: v7x
topology: tpu7x:2x2x1
jax: 0.10.0
libtpu: 0.0.40
codegen_flags: <defaults>
</compile_context>

<pallas_src>
import functools

import jax
import jax.numpy as jnp
from jax.experimental import pallas as pl
from jax.experimental.pallas import tpu as pltpu


def _round_up(x, m):
    return ((x + m - 1) // m) * m


@functools.lru_cache(maxsize=1)
def _single_buffer_supported():
    """Probe whether BlockSpec(pipeline_mode=pl.Buffered(1)) compiles here.

    Used to drop the dead second buffer of a VMEM-resident operand (block
    index constant across the whole grid). Falls back to default double
    buffering on jax versions without pipeline_mode support.
    """
    if not hasattr(pl, "Buffered"):
        return False
    try:
        def k(x_ref, o_ref):
            o_ref[...] = x_ref[...]

        f = pl.pallas_call(
            k,
            out_shape=jax.ShapeDtypeStruct((8, 128), jnp.float32),
            grid=(1,),
            in_specs=[pl.BlockSpec((8, 128), lambda i: (0, 0),
                                   pipeline_mode=pl.Buffered(1))],
            out_specs=pl.BlockSpec((8, 128), lambda i: (0, 0)),
        )
        jax.jit(f).lower(jax.ShapeDtypeStruct((8, 128), jnp.float32)).compile()
        return True
    except Exception:
        return False


def _spec(shape, index_map, *, single_buffer=False):
    if single_buffer and _single_buffer_supported():
        return pl.BlockSpec(shape, index_map, pipeline_mode=pl.Buffered(1))
    return pl.BlockSpec(shape, index_map)


def _choose_tm(M, align_m, max_tm=512):
    """Pick an M tile: large, low padding, even tile count (v7x megacore)."""
    if M <= max_tm:
        return _round_up(M, align_m)
    best = None
    cand = (max_tm // align_m) * align_m
    while cand >= 128:
        mp = _round_up(M, cand)
        n_m = mp // cand
        score = (mp - M, n_m % 2, -cand)   # waste, odd-tile penalty, prefer big
        if best is None or score < best[0]:
            best = (score, cand)
        cand -= align_m
    return best[1] if best is not None else max_tm


def _choose_tn(Hp, max_tn=1024):
    """Pick an N tile (multiple of 128, lane-dense); returns (TN, padded Hp)."""
    if Hp <= max_tn:
        return Hp, Hp
    best = None
    for tn in range(max_tn, 127, -128):
        hp = _round_up(Hp, tn)
        score = (hp - Hp, -tn)
        if best is None or score < best[0]:
            best = (score, tn, hp)
    _, tn, hp = best
    return tn, hp


def _patch_embed_kernel(x_ref, w_ref, b_ref, o_ref):
    # x_ref: (TM, Kp) patch tile; w_ref: (Kp, TN) weight tile (VMEM-resident);
    # b_ref: (1, TN) f32 bias; o_ref: (TM, TN) output tile.
    acc = jnp.dot(x_ref[...], w_ref[...], preferred_element_type=jnp.float32)
    o_ref[...] = (acc + b_ref[...]).astype(o_ref.dtype)


def patch_embedding(x, weight, bias, *, patch_size,
                    compute_dtype=jnp.bfloat16, out_dtype=None):
    """x: (B, C, H, W) NCHW; weight: (hidden, C, P, P); bias: (hidden,).

    Returns (B, num_patches, hidden), matching PyTorch
    conv(x).flatten(2).transpose(1, 2).
    """
    B, C, H, W = x.shape
    hidden = weight.shape[0]
    P = patch_size
    assert H % P == 0 and W % P == 0
    nh, nw = H // P, W // P
    num_patches = nh * nw

    M = B * num_patches
    K = C * P * P
    out_dtype = x.dtype if out_dtype is None else out_dtype
    cd_size = jnp.dtype(compute_dtype).itemsize
    out_size = jnp.dtype(out_dtype).itemsize

    # ---- tile / padding geometry -------------------------------------------
    Kp = _round_up(K, 128)                        # lane-dense contraction dim
    Hp = _round_up(hidden, 128)                   # lane-dense output dim
    TN, Hp = _choose_tn(Hp)
    n_n = Hp // TN

    align_m = 16 if cd_size < 4 else 8            # bf16 packs 2 rows / sublane
    TM = _choose_tm(M, align_m, 512)

    w_bufs = 1 if (n_n == 1 and _single_buffer_supported()) else 2

    def footprint(tm):
        return (2 * tm * Kp * cd_size            # x double buffer
                + w_bufs * Kp * TN * cd_size     # resident weight buffer(s)
                + 2 * TN * 4                     # bias
                + 2 * tm * TN * out_size)        # output double buffer

    # VMEM guard: keep comfortably under v7x's 64 MiB per-TensorCore VMEM.
    while footprint(TM) > (40 << 20) and TM > 128:
        TM = max(128, _round_up(TM // 2, align_m))

    Mp = _round_up(M, TM)
    n_m = Mp // TM

    # ---- loop order: keep the operand with the larger re-stream cost resident
    n_outer_traffic = n_n * Mp * Kp + Kp * Hp     # weight resident (N outer)
    m_outer_traffic = Mp * Kp + n_m * Kp * Hp     # patches resident (M outer)
    weight_resident = n_outer_traffic <= m_outer_traffic

    if weight_resident:
        grid = (n_n, n_m)                         # N outer, M inner
        x_spec = _spec((TM, Kp), lambda j, i: (i, 0))
        w_spec = _spec((Kp, TN), lambda j, i: (0, j), single_buffer=(n_n == 1))
        b_spec = _spec((1, TN), lambda j, i: (0, j), single_buffer=(n_n == 1))
        o_spec = pl.BlockSpec((TM, TN), lambda j, i: (i, j))
        read_bytes = n_n * Mp * Kp * cd_size + Kp * Hp * cd_size
    else:
        grid = (n_m, n_n)                         # M outer, N inner
        x_spec = _spec((TM, Kp), lambda i, j: (i, 0), single_buffer=(n_m == 1))
        w_spec = _spec((Kp, TN), lambda i, j: (0, j))
        b_spec = _spec((1, TN), lambda i, j: (0, j))
        o_spec = pl.BlockSpec((TM, TN), lambda i, j: (i, j))
        read_bytes = Mp * Kp * cd_size + n_m * Kp * Hp * cd_size

    need = footprint(TM)
    vmem_limit = int(min(64 << 20, max(need + (need >> 1) + (2 << 20), 16 << 20)))

    # ---- layout glue (im2col; intended to fuse into the pallas_call input) --
    xp = x.reshape(B, C, nh, P, nw, P)
    xp = jnp.transpose(xp, (0, 2, 4, 1, 3, 5))            # (B, nh, nw, C, P, P)
    patch_mat = xp.reshape(M, K).astype(compute_dtype)    # (M, K), (c,ph,pw)
    if (Mp, Kp) != (M, K):
        patch_mat = jnp.pad(patch_mat, ((0, Mp - M), (0, Kp - K)))
    # TODO(synk): verify in the HLO that the transpose+pad fuses into the
    # pallas_call operand (allow_input_fusion); if XLA materializes it in HBM,
    # move the patch flattening into the kernel via a BlockSpec over the
    # (B, nh, nw, C, P, P) view.

    w_mat = weight.reshape(hidden, K).T.astype(compute_dtype)   # (K, hidden)
    if (Kp, Hp) != (K, hidden):
        w_mat = jnp.pad(w_mat, ((0, Kp - K), (0, Hp - hidden)))

    b_mat = bias.astype(jnp.float32).reshape(1, hidden)          # f32 epilogue
    if Hp != hidden:
        b_mat = jnp.pad(b_mat, ((0, 0), (0, Hp - hidden)))

    cost = pl.CostEstimate(
        flops=2 * Mp * Kp * Hp,
        transcendentals=0,
        bytes_accessed=read_bytes + Hp * 4 + Mp * Hp * out_size,
    )

    out = pl.pallas_call(
        _patch_embed_kernel,
        out_shape=jax.ShapeDtypeStruct((Mp, Hp), out_dtype),
        grid_spec=pltpu.PrefetchScalarGridSpec(
            num_scalar_prefetch=0,
            grid=grid,
            in_specs=[x_spec, w_spec, b_spec],
            out_specs=o_spec,
        ),
        compiler_params=pltpu.CompilerParams(
            dimension_semantics=("parallel", "parallel"),
            allow_input_fusion=[True, False, False],
            vmem_limit_bytes=vmem_limit,
        ),
        cost_estimate=cost,
    )(patch_mat, w_mat, b_mat)

    out = out[:M, :hidden]
    return out.reshape(B, num_patches, hidden)


if __name__ == "__main__":
    # FLAGS: in_chans=4, patch_size=4, hidden_size=32; image 16x16, batch=2.
    B, C, Himg, Wimg = 2, 4, 16, 16
    patch_size = 4
    hidden_size = 32

    key = jax.random.PRNGKey(0)
    kx, kw, kb = jax.random.split(key, 3)

    x = jax.random.normal(kx, (B, C, Himg, Wimg), dtype=jnp.float32)
    # Conv2d-style parameters: weight (out, in, P, P), bias (out,).
    fan_in = C * patch_size * patch_size
    bound = 1.0 / (fan_in ** 0.5)
    weight = jax.random.uniform(
        kw, (hidden_size, C, patch_size, patch_size),
        minval=-bound, maxval=bound, dtype=jnp.float32)
    bias = jax.random.uniform(
        kb, (hidden_size,), minval=-bound, maxval=bound, dtype=jnp.float32)

    # Pure-JAX reference of the same conv semantics (the PyTorch forward).
    ref = jax.lax.conv_general_dilated(
        x, weight, window_strides=(patch_size, patch_size), padding="VALID",
        dimension_numbers=("NCHW", "OIHW", "NCHW"))
    ref = ref + bias[None, :, None, None]
    ref = ref.reshape(B, hidden_size, -1).transpose(0, 2, 1)

    n_patches = (Himg // patch_size) * (Wimg // patch_size)

    # f32 compute path: strict numerical check.
    fwd_f32 = jax.jit(functools.partial(
        patch_embedding, patch_size=patch_size, compute_dtype=jnp.float32))
    out_f32 = jax.block_until_ready(fwd_f32(x, weight, bias))
    assert out_f32.shape == (B, n_patches, hidden_size)
    assert jnp.allclose(out_f32, ref, atol=1e-5, rtol=1e-5)

    # bf16 MXU operands (default), f32 accumulation: looser tolerance.
    fwd_bf16 = jax.jit(functools.partial(
        patch_embedding, patch_size=patch_size, compute_dtype=jnp.bfloat16))
    out_bf16 = jax.block_until_ready(fwd_bf16(x, weight, bias))
    assert out_bf16.shape == (B, n_patches, hidden_size)
    assert jnp.allclose(out_bf16, ref, atol=2e-2, rtol=2e-2)

    # bf16 output path (halves writeback bytes for downstream bf16 consumers).
    fwd_bf16_out = jax.jit(functools.partial(
        patch_embedding, patch_size=patch_size,
        compute_dtype=jnp.bfloat16, out_dtype=jnp.bfloat16))
    out_b = jax.block_until_ready(fwd_bf16_out(x, weight, bias))
    assert out_b.dtype == jnp.bfloat16 and out_b.shape == (B, n_patches, hidden_size)
    assert jnp.allclose(out_b.astype(jnp.float32), ref, atol=3e-2, rtol=3e-2)

    print("KERNEL_OK")
</pallas_src>

<mosaic_0001>
module attributes {stable_mosaic.version = 11 : i64} {
  func.func @_patch_embed_kernel(%arg0: i32, %arg1: i32, %arg2: memref<32x128xf32, #tpu.memory_space<vmem>>, %arg3: memref<128x128xf32, #tpu.memory_space<vmem>>, %arg4: memref<1x128xf32, #tpu.memory_space<vmem>>, %arg5: memref<32x128xf32, #tpu.memory_space<vmem>>) attributes {dimension_semantics = [#tpu.dimension_semantics<parallel>, #tpu.dimension_semantics<parallel>], iteration_bounds = array<i64: 1, 1>, scalar_prefetch = 0 : i64, scratch_operands = 0 : i64, tpu.core_type = #tpu.core_type<tc>, window_params = [{transform_indices = @transform_0, window_bounds = array<i64: 32, 128>}, {transform_indices = @transform_1, window_bounds = array<i64: 128, 128>}, {transform_indices = @transform_2, window_bounds = array<i64: 1, 128>}, {transform_indices = @transform_3, window_bounds = array<i64: 32, 128>}]} {
    %c0 = arith.constant 0 : index
    %c0_0 = arith.constant 0 : index
    %0 = vector.load %arg2[%c0, %c0_0] : memref<32x128xf32, #tpu.memory_space<vmem>>, vector<32x128xf32>
    %c0_1 = arith.constant 0 : index
    %c0_2 = arith.constant 0 : index
    %1 = vector.load %arg3[%c0_1, %c0_2] : memref<128x128xf32, #tpu.memory_space<vmem>>, vector<128x128xf32>
    %cst = arith.constant dense<0.000000e+00> : vector<32x128xf32>
    %2 = tpu.matmul %0, %1, %cst {dimension_numbers = #tpu.dot_dimension_numbers<[1], [0], [0], [1], [0, 0, 1, 1], [], []>} : vector<32x128xf32>, vector<128x128xf32>, vector<32x128xf32> -> vector<32x128xf32>
    %c0_3 = arith.constant 0 : index
    %c0_4 = arith.constant 0 : index
    %3 = vector.load %arg4[%c0_3, %c0_4] : memref<1x128xf32, #tpu.memory_space<vmem>>, vector<1x128xf32>
    %4 = vector.broadcast %3 : vector<1x128xf32> to vector<32x128xf32>
    %5 = arith.addf %2, %4 : vector<32x128xf32>
    %c0_5 = arith.constant 0 : index
    %c0_6 = arith.constant 0 : index
    %6 = vector.load %arg5[%c0_5, %c0_6] : memref<32x128xf32, #tpu.memory_space<vmem>>, vector<32x128xf32>
    tpu.vector_store %arg5[%c0_5, %c0_6], %5 {strides = array<i32>} : memref<32x128xf32, #tpu.memory_space<vmem>>, vector<32x128xf32>,
    return
  }
  func.func @transform_0(%arg0: i32, %arg1: i32) -> (i32, i32) {
    %c0_i32 = arith.constant 0 : i32
    %c0_i32_0 = arith.constant 0 : i32
    return %arg1, %c0_i32 : i32, i32
  }
  func.func @transform_1(%arg0: i32, %arg1: i32) -> (i32, i32) {
    %c0_i32 = arith.constant 0 : i32
    %c0_i32_0 = arith.constant 0 : i32
    return %c0_i32, %arg0 : i32, i32
  }
  func.func @transform_2(%arg0: i32, %arg1: i32) -> (i32, i32) {
    %c0_i32 = arith.constant 0 : i32
    %c0_i32_0 = arith.constant 0 : i32
    return %c0_i32, %arg0 : i32, i32
  }
  func.func @transform_3(%arg0: i32, %arg1: i32) -> (i32, i32) {
    %c0_i32 = arith.constant 0 : i32
    return %arg1, %arg0 : i32, i32
  }
}

</mosaic_0001>

<bundles_post_ra>
// kernel: patch_embedding.2
= control target key start
LH: loop header
LB: loop body
LE: loop exit
PB: predicated region body
PF: predicated region fallthrough
CT: control target
= control target key end

     0   :  { %s440_s0 = inlined_call_operand.vmem [shape: f32[128,128], index: 0, kind: input, shape index: {}]   ;;  %s441_s1 = inlined_call_operand.vmem [shape: f32[1,128], index: 1, kind: input, shape index: {}]   ;;  %s442_s2 = inlined_call_operand.vmem [shape: f32[32,64], index: 2, kind: input, shape index: {}]   ;;  %s443_s3 = inlined_call_operand.<no memory space> [shape: f32[], index: 3, kind: input, shape index: {}]   ;;  %s444_s4 = inlined_call_operand.hbm [shape: f32[32,128], index: 4, kind: output, shape index: {}]  }
   0x1   :  { %v355_v0 = vstv %s443_s3 }
   0x2   :  { %v59_v1 = vld [vmem:[%s440_s0] sm:$0xff]  ;;  %v60_v2 = vld [vmem:[%s440_s0 + $0x8] sm:$0xff]  ;;  %v61_v3 = vld [vmem:[%s440_s0 + $0x10] sm:$0xff]  ;;  %v18_v4 = vlaneseq }
   0x3   :  { %v249_v5 = vpack.c.bf16 %v60_v2, %v59_v1  ;;  %v62_v6 = vld [vmem:[%s440_s0 + $0x18] sm:$0xff]  ;;  %v63_v8 = vld [vmem:[%s440_s0 + $0x20] sm:$0xff]  ;;  %v64_v9 = vld [vmem:[%s440_s0 + $0x28] sm:$0xff] }
   0x4   :  { %v253_v7 = vpack.c.bf16 %v62_v6, %v61_v3  ;;  %v19_v10 = vand.u32 127, %v18_v4  ;;  %v257_v11 = vpack.c.bf16 %v64_v9, %v63_v8  ;;  %v17_v12 = vld [vmem:[%s442_s2] sm:$0xff]  ;;  %v188_v13 = vld [vmem:[%s442_s2 + $0x10] sm:$0xff]  ;;  %v66_v15 = vld [vmem:[%s440_s0 + $0x38] sm:$0xff] }
   0x5   :  { %250 = vmatprep.subr.bf16.mxu0 %v249_v5  ;;  %281 = vmatprep.subr.bf16.mxu1 %v249_v5  ;;  %v65_v14 = vld [vmem:[%s440_s0 + $0x30] sm:$0xff] }
   0x6   :  { %252 = vmatpush3.bf16.msra.mxu0 %v249_v5  ;;  %289 = vmatpush3.bf16.msra.mxu1 %v249_v5  ;;  %vm21_vm0 = vcmp.lt.s32.totalorder %v19_v10, 64 }
   0x7   :  { %254 = vmatprep.subr.bf16.mxu0 %v253_v7  ;;  %282 = vmatprep.subr.bf16.mxu1 %v253_v7  ;;  %v22_v16 = vsel %vm21_vm0, %v17_v12, %v355_v0  ;;  %v41_v17 = vsel %vm21_vm0, %v188_v13, %v355_v0 }
   0x8   :  { %10 = vsyncpa [#allocation8], 0  ;;  %243 = vmatprep.mubr.f32.mxu0 %v22_v16  ;;  %246 = vmatprep.mubr.f32.mxu1 %v41_v17  ;;  %v261_v18 = vpack.c.bf16 %v66_v15, %v65_v14  ;;  %v67_v19 = vld [vmem:[%s440_s0 + $0x40] sm:$0xff]  ;;  %v68_v20 = vld [vmem:[%s440_s0 + $0x48] sm:$0xff]  ;;  %s324_s30 = smov [#allocation7]  }
   0x9   :  { %v265_v21 = vpack.c.bf16 %v68_v20, %v67_v19  ;;  %v69_v22 = vld [vmem:[%s440_s0 + $0x50] sm:$0xff]  ;;  %v70_v23 = vld [vmem:[%s440_s0 + $0x58] sm:$0xff]  ;;  %v71_v25 = vld [vmem:[%s440_s0 + $0x60] sm:$0xff]  ;;  %s176_s5 = sshll.u32 %s324_s30, 4  ;;  %s177_s5 = int_to_ptr.vmem [resolvable:$true] %s176_s5 }
   0xa   :  { %256 = vmatpush3.bf16.msra.mxu0 %v253_v7  ;;  %290 = vmatpush3.bf16.msra.mxu1 %v253_v7  ;;  %v269_v24 = vpack.c.bf16 %v70_v23, %v69_v22  ;;  %v72_v26 = vld [vmem:[%s440_s0 + $0x68] sm:$0xff]  ;;  %v73_v28 = vld [vmem:[%s440_s0 + $0x70] sm:$0xff]  ;;  %v74_v29 = vld [vmem:[%s440_s0 + $0x78] sm:$0xff]  ;;  %p305_p1 = scmp.lt.s32.totalorder %s177_s5, %s177_s5 }
   0xb   :  { %258 = vmatprep.subr.bf16.mxu0 %v257_v11  ;;  %283 = vmatprep.subr.bf16.mxu1 %v257_v11  ;;  %v273_v27 = vpack.c.bf16 %v72_v26, %v71_v25  ;;  %v277_v30 = vpack.c.bf16 %v74_v29, %v73_v28  ;;  %v187_v31 = vld [vmem:[%s442_s2 + $0x8] sm:$0xff]  ;;  %v189_v32 = vld [vmem:[%s442_s2 + $0x18] sm:$0xff]  ;;  %v190_v35 = vld [vmem:[%s441_s1] ss:$0 sm:$0xff]  ;;  %s300_s2 = scalar_lea.vmem %s177_s5, 512 }
   0xc   :  { %v31_v33 = vsel %vm21_vm0, %v187_v31, %v355_v0  ;;  %v51_v34 = vsel %vm21_vm0, %v189_v32, %v355_v0  ;;  %p301_p0 = scmp.ne.s32.totalorder %s177_s5, %s300_s2  ;;  %p306_p2 = scmp.lt.s32.totalorder %s300_s2, %s300_s2 }
   0xe   :  { %260 = vmatpush3.bf16.msra.mxu0 %v257_v11  ;;  %291 = vmatpush3.bf16.msra.mxu1 %v257_v11  ;;  %p307_p3 = por %p306_p2, %p305_p1 }
   0xf   :  { %262 = vmatprep.subr.bf16.mxu0 %v261_v18  ;;  %284 = vmatprep.subr.bf16.mxu1 %v261_v18 }
  0x10   :  { %p308_p4 = pnand %p307_p3, %p301_p0 }
  0x12   :  { %264 = vmatpush3.bf16.msra.mxu0 %v261_v18  ;;  %292 = vmatpush3.bf16.msra.mxu1 %v261_v18 }
  0x13   :  { %266 = vmatprep.subr.bf16.mxu0 %v265_v21  ;;  %285 = vmatprep.subr.bf16.mxu1 %v265_v21 }
  0x16   :  { %268 = vmatpush3.bf16.msra.mxu0 %v265_v21  ;;  %293 = vmatpush3.bf16.msra.mxu1 %v265_v21 }
  0x17   :  { %270 = vmatprep.subr.bf16.mxu0 %v269_v24  ;;  %286 = vmatprep.subr.bf16.mxu1 %v269_v24 }
  0x1a   :  { %272 = vmatpush3.bf16.msra.mxu0 %v269_v24  ;;  %294 = vmatpush3.bf16.msra.mxu1 %v269_v24 }
  0x1b   :  { %274 = vmatprep.subr.bf16.mxu0 %v273_v27  ;;  %287 = vmatprep.subr.bf16.mxu1 %v273_v27 }
  0x1e   :  { %276 = vmatpush3.bf16.msra.mxu0 %v273_v27  ;;  %295 = vmatpush3.bf16.msra.mxu1 %v273_v27 }
  0x1f   :  { %278 = vmatprep.subr.bf16.mxu0 %v277_v30  ;;  %288 = vmatprep.subr.bf16.mxu1 %v277_v30 }
  0x22   :  { %280 = vmatpush3.bf16.msra.mxu0 %v277_v30  ;;  %296 = vmatpush3.bf16.msra.mxu1 %v277_v30 }
  0x25   :  { %244 = vmatmul.mubr.f32.vlgmr.msra.gmra.mrb[0].mxu0 %v31_v33  ;;  %247 = vmatmul.mubr.f32.vlgmr.msra.gmra.mrb[0].mxu1 %v51_v34 }
  0xf8   :  { %v245_v36 = vpop.f32.mrb[0].mxu0  ;;  %v248_v37 = vpop.f32.mrb[0].mxu1 }
  0xf9   :  { %v154_v38 = vadd.f32 %v245_v36, %v190_v35  ;;  %v164_v39 = vadd.f32 %v248_v37, %v190_v35  ;;  %v148_v40 = vpop.f32.mrb[1].mxu0  ;;  %v158_v41 = vpop.f32.mrb[1].mxu1 }
  0xfa   :  { %v149_v42 = vadd.f32 %v190_v35, %v148_v40  ;;  %v159_v43 = vadd.f32 %v190_v35, %v158_v41 }
  0xfb   :  { %168 = vst [vmem:[#allocation7 + $0x8] sm:$0xff] %v154_v38  ;;  %170 = vst [vmem:[#allocation7 + $0x18] sm:$0xff] %v164_v39 }
  0xfc   :  { %167 = vst [vmem:[#allocation7] sm:$0xff] %v149_v42  ;;  %169 = vst [vmem:[#allocation7 + $0x10] sm:$0xff] %v159_v43 }
  0xfd   :  { %311 = shalt.err (!%p308_p4)
}
  0xfe   :  { %s312_s7 = scalar_lea.hbm %s444_s4, 512 }
  0xff   :  { %p313_p5 = scmp.ne.s32.totalorder %s444_s4, %s312_s7  ;;  %p316_p6 = scmp.lt.u32.totalorder %s312_s7, %s444_s4 }
 0x101   :  { %p318_p7 = pnand %p316_p6, %p313_p5 }
 0x103   :  { %321 = shalt.err (!%p318_p7)
}
 0x104   :  { %s325_s12 = smov 128   ;;  %s326_s13 = smov 8  }
 0x105   :  { %182 = dma.vmem_to_hbm [thread:$0]  %s177_s5, 512, %s444_s4, [#allocation8], %s325_s12, %s325_s12, %s326_s13  }
 0x106   :  { %322 = dma.done.wait [#allocation8], 512  }
 0x107   :  { %323 = vsyncadd [#allocation8], 4294966784 }
 0x108   :  { %186 = vsyncpa [#allocation8], 1 }

</bundles_post_ra>
